<compile_context>
chip_gen: v5e
topology: v5e:2x2
jax: 0.10.0
libtpu: 0.0.40
codegen_flags: <defaults>
</compile_context>

<pallas_src>
import functools

import jax
import jax.numpy as jnp
from jax.experimental import pallas as pl
from jax.experimental.pallas import tpu as pltpu


def _resident_gather_kernel(idx_ref, table_ref, out_ref, *, tile_rows):
    """Whole table resident in VMEM; gather `tile_rows` rows per grid step.

    idx_ref:   SMEM (padded_B,) int32  -- scalar-prefetched class ids
    table_ref: VMEM (n_classes, E)     -- entire embedding table (resident)
    out_ref:   VMEM (tile_rows, E)     -- output slab for this grid step
    """
    base = pl.program_id(0) * tile_rows
    for t in range(tile_rows):                       # small static unroll
        idx = idx_ref[base + t]
        out_ref[pl.ds(t, 1), :] = table_ref[pl.ds(idx, 1), :]


def _rowdma_gather_kernel(idx_ref, table_hbm, out_ref, rows_vmem, sems, *, tile_rows):
    """Table stays in HBM; keep `tile_rows` row DMAs in flight, then one slab store.

    idx_ref:   SMEM (padded_B,) int32
    table_hbm: HBM  (n_classes, E)     -- memory_space=pl.ANY, manual DMA
    out_ref:   VMEM (tile_rows, E)
    rows_vmem: VMEM (tile_rows, E) scratch
    sems:      DMA semaphores (tile_rows,)
    """
    base = pl.program_id(0) * tile_rows
    # Start ALL row DMAs before waiting on any -> tile_rows copies outstanding.
    for t in range(tile_rows):
        idx = idx_ref[base + t]
        pltpu.make_async_copy(table_hbm.at[idx], rows_vmem.at[t], sems.at[t]).start()
    for t in range(tile_rows):
        # Only dst shape + semaphore matter for the wait descriptor.
        pltpu.make_async_copy(table_hbm.at[0], rows_vmem.at[t], sems.at[t]).wait()
    out_ref[...] = rows_vmem[...]


def class_embedder_forward(
    batch,
    embedding_table,
    key="class",
    vmem_table_budget_bytes=16 * 1024 * 1024,
    min_pallas_batch=8,
):
    """JAX/Pallas equivalent of ClassEmbedder.forward -> (B, 1, E)."""
    ids = batch[key].reshape(-1).astype(jnp.int32)           # (B,)
    n_classes, embed_dim = embedding_table.shape
    B = ids.shape[0]
    dtype = embedding_table.dtype

    # Bounds safety: clamp instead of silently DMA-ing out of range.
    ids = jnp.clip(ids, 0, n_classes - 1)

    # Tiny batches: a standalone pallas_call launch costs more than the gather.
    if B < min_pallas_batch:
        return jnp.take(embedding_table, ids, axis=0)[:, None, :]

    # Rows per grid step: multiple of the sublane packing, capped at 32.
    sublane = 16 if dtype == jnp.bfloat16 else 8
    tile_rows = min(32, pl.cdiv(min(B, 32), sublane) * sublane)
    padded_B = pl.cdiv(B, tile_rows) * tile_rows
    ids_padded = jnp.pad(ids, (0, padded_B - B))              # pad with valid row 0
    grid = (padded_B // tile_rows,)

    dsize = embedding_table.dtype.itemsize
    table_bytes = n_classes * embed_dim * dsize

    out_spec = pl.BlockSpec((tile_rows, embed_dim), lambda i, idx_ref: (i, 0))
    out_shape = jax.ShapeDtypeStruct((padded_B, embed_dim), dtype)

    if table_bytes <= vmem_table_budget_bytes:
        # Fast path: whole table resident in VMEM; per-row access = VMEM load.
        vmem_limit = int(
            min(56 << 20,
                max(32 << 20,
                    table_bytes + 4 * tile_rows * embed_dim * dsize + (4 << 20))))
        out2d = pl.pallas_call(
            functools.partial(_resident_gather_kernel, tile_rows=tile_rows),
            out_shape=out_shape,
            grid_spec=pltpu.PrefetchScalarGridSpec(
                num_scalar_prefetch=1,                 # ids land in SMEM
                grid=grid,
                in_specs=[pl.BlockSpec(memory_space=pltpu.MemorySpace.VMEM)],
                out_specs=out_spec,
            ),
            compiler_params=pltpu.CompilerParams(
                dimension_semantics=("parallel",),     # rows independent (v7x 2-TC)
                vmem_limit_bytes=vmem_limit,
            ),
        )(ids_padded, embedding_table)
    else:
        # Large tables: table stays in HBM, batched manual row DMAs per step.
        out2d = pl.pallas_call(
            functools.partial(_rowdma_gather_kernel, tile_rows=tile_rows),
            out_shape=out_shape,
            grid_spec=pltpu.PrefetchScalarGridSpec(
                num_scalar_prefetch=1,
                grid=grid,
                in_specs=[pl.BlockSpec(memory_space=pl.ANY)],
                out_specs=out_spec,
                scratch_shapes=[
                    pltpu.VMEM((tile_rows, embed_dim), dtype),
                    pltpu.SemaphoreType.DMA((tile_rows,)),
                ],
            ),
            compiler_params=pltpu.CompilerParams(
                dimension_semantics=("parallel",),
            ),
        )(ids_padded, embedding_table)

    return out2d[:B].reshape(B, 1, embed_dim)


if __name__ == "__main__":
    # Module hyperparameters (small demo, consistent with the module's __init__)
    n_classes = 1000
    embed_dim = 128      # lane-dense output
    B = 16               # big enough to exercise the Pallas paths

    rng = jax.random.PRNGKey(0)
    k_table, k_idx = jax.random.split(rng)

    # nn.Embedding default init: weights ~ N(0, 1)
    embedding_table = jax.random.normal(
        k_table, (n_classes, embed_dim), dtype=jnp.float32
    )
    class_ids = jax.random.randint(k_idx, (B,), 0, n_classes, dtype=jnp.int32)
    batch = {"class": class_ids}

    ref = embedding_table[class_ids][:, None, :]

    # Path 1: table-resident VMEM fast path (1000 x 128 f32 = 512 KiB table).
    out_resident = jax.block_until_ready(
        class_embedder_forward(batch, embedding_table, key="class"))
    assert out_resident.shape == (B, 1, embed_dim), out_resident.shape
    assert jnp.allclose(out_resident, ref), "resident path mismatch vs reference"

    # Path 2: HBM row-DMA path (forced by zeroing the resident budget).
    out_rowdma = jax.block_until_ready(
        class_embedder_forward(batch, embedding_table, key="class",
                               vmem_table_budget_bytes=0))
    assert out_rowdma.shape == (B, 1, embed_dim), out_rowdma.shape
    assert jnp.allclose(out_rowdma, ref), "row-DMA path mismatch vs reference"

    # Path 3: tiny-batch XLA fallback (B=2, like the original demo).
    tiny_batch = {"class": class_ids[:2]}
    out_tiny = jax.block_until_ready(
        class_embedder_forward(tiny_batch, embedding_table, key="class"))
    assert out_tiny.shape == (2, 1, embed_dim), out_tiny.shape
    assert jnp.allclose(out_tiny, ref[:2]), "tiny-batch fallback mismatch"

    print("KERNEL_OK")
</pallas_src>

<mosaic_0001>
module attributes {stable_mosaic.version = 11 : i64} {
  func.func @_resident_gather_kernel(%arg0: i32, %arg1: memref<16xi32, #tpu.memory_space<smem>>, %arg2: memref<1000x128xf32, #tpu.memory_space<vmem>>, %arg3: memref<16x128xf32, #tpu.memory_space<vmem>>) attributes {dimension_semantics = [#tpu.dimension_semantics<parallel>], iteration_bounds = array<i64: 1>, scalar_prefetch = 1 : i64, scratch_operands = 0 : i64, tpu.core_type = #tpu.core_type<tc>, window_params = [{pipeline_mode = #tpu.pipeline_mode<synchronous>, transform_indices = @transform_0, window_bounds = array<i64: 1000, 128>}, {transform_indices = @transform_1, window_bounds = array<i64: 16, 128>}]} {
    %c16_i32 = arith.constant 16 : i32
    %0 = arith.muli %arg0, %c16_i32 : i32
    %c0_i32 = arith.constant 0 : i32
    %1 = arith.addi %0, %c0_i32 : i32
    %2 = arith.index_cast %1 : i32 to index
    %3 = memref.load %arg1[%2] : memref<16xi32, #tpu.memory_space<smem>>
    %4 = arith.index_cast %3 : i32 to index
    %c0 = arith.constant 0 : index
    %5 = vector.load %arg2[%4, %c0] : memref<1000x128xf32, #tpu.memory_space<vmem>>, vector<1x128xf32>
    %c0_0 = arith.constant 0 : index
    %c0_1 = arith.constant 0 : index
    %6 = vector.load %arg3[%c0_0, %c0_1] : memref<16x128xf32, #tpu.memory_space<vmem>>, vector<1x128xf32>
    tpu.vector_store %arg3[%c0_0, %c0_1], %5 {strides = array<i32>} : memref<16x128xf32, #tpu.memory_space<vmem>>, vector<1x128xf32>,
    %c1_i32 = arith.constant 1 : i32
    %7 = arith.addi %0, %c1_i32 : i32
    %8 = arith.index_cast %7 : i32 to index
    %9 = memref.load %arg1[%8] : memref<16xi32, #tpu.memory_space<smem>>
    %10 = arith.index_cast %9 : i32 to index
    %c0_2 = arith.constant 0 : index
    %11 = vector.load %arg2[%10, %c0_2] : memref<1000x128xf32, #tpu.memory_space<vmem>>, vector<1x128xf32>
    %c1 = arith.constant 1 : index
    %c0_3 = arith.constant 0 : index
    %12 = vector.load %arg3[%c1, %c0_3] : memref<16x128xf32, #tpu.memory_space<vmem>>, vector<1x128xf32>
    tpu.vector_store %arg3[%c1, %c0_3], %11 {strides = array<i32>} : memref<16x128xf32, #tpu.memory_space<vmem>>, vector<1x128xf32>,
    %c2_i32 = arith.constant 2 : i32
    %13 = arith.addi %0, %c2_i32 : i32
    %14 = arith.index_cast %13 : i32 to index
    %15 = memref.load %arg1[%14] : memref<16xi32, #tpu.memory_space<smem>>
    %16 = arith.index_cast %15 : i32 to index
    %c0_4 = arith.constant 0 : index
    %17 = vector.load %arg2[%16, %c0_4] : memref<1000x128xf32, #tpu.memory_space<vmem>>, vector<1x128xf32>
    %c2 = arith.constant 2 : index
    %c0_5 = arith.constant 0 : index
    %18 = vector.load %arg3[%c2, %c0_5] : memref<16x128xf32, #tpu.memory_space<vmem>>, vector<1x128xf32>
    tpu.vector_store %arg3[%c2, %c0_5], %17 {strides = array<i32>} : memref<16x128xf32, #tpu.memory_space<vmem>>, vector<1x128xf32>,
    %c3_i32 = arith.constant 3 : i32
    %19 = arith.addi %0, %c3_i32 : i32
    %20 = arith.index_cast %19 : i32 to index
    %21 = memref.load %arg1[%20] : memref<16xi32, #tpu.memory_space<smem>>
    %22 = arith.index_cast %21 : i32 to index
    %c0_6 = arith.constant 0 : index
    %23 = vector.load %arg2[%22, %c0_6] : memref<1000x128xf32, #tpu.memory_space<vmem>>, vector<1x128xf32>
    %c3 = arith.constant 3 : index
    %c0_7 = arith.constant 0 : index
    %24 = vector.load %arg3[%c3, %c0_7] : memref<16x128xf32, #tpu.memory_space<vmem>>, vector<1x128xf32>
    tpu.vector_store %arg3[%c3, %c0_7], %23 {strides = array<i32>} : memref<16x128xf32, #tpu.memory_space<vmem>>, vector<1x128xf32>,
    %c4_i32 = arith.constant 4 : i32
    %25 = arith.addi %0, %c4_i32 : i32
    %26 = arith.index_cast %25 : i32 to index
    %27 = memref.load %arg1[%26] : memref<16xi32, #tpu.memory_space<smem>>
    %28 = arith.index_cast %27 : i32 to index
    %c0_8 = arith.constant 0 : index
    %29 = vector.load %arg2[%28, %c0_8] : memref<1000x128xf32, #tpu.memory_space<vmem>>, vector<1x128xf32>
    %c4 = arith.constant 4 : index
    %c0_9 = arith.constant 0 : index
    %30 = vector.load %arg3[%c4, %c0_9] : memref<16x128xf32, #tpu.memory_space<vmem>>, vector<1x128xf32>
    tpu.vector_store %arg3[%c4, %c0_9], %29 {strides = array<i32>} : memref<16x128xf32, #tpu.memory_space<vmem>>, vector<1x128xf32>,
    %c5_i32 = arith.constant 5 : i32
    %31 = arith.addi %0, %c5_i32 : i32
    %32 = arith.index_cast %31 : i32 to index
    %33 = memref.load %arg1[%32] : memref<16xi32, #tpu.memory_space<smem>>
    %34 = arith.index_cast %33 : i32 to index
    %c0_10 = arith.constant 0 : index
    %35 = vector.load %arg2[%34, %c0_10] : memref<1000x128xf32, #tpu.memory_space<vmem>>, vector<1x128xf32>
    %c5 = arith.constant 5 : index
    %c0_11 = arith.constant 0 : index
    %36 = vector.load %arg3[%c5, %c0_11] : memref<16x128xf32, #tpu.memory_space<vmem>>, vector<1x128xf32>
    tpu.vector_store %arg3[%c5, %c0_11], %35 {strides = array<i32>} : memref<16x128xf32, #tpu.memory_space<vmem>>, vector<1x128xf32>,
    %c6_i32 = arith.constant 6 : i32
    %37 = arith.addi %0, %c6_i32 : i32
    %38 = arith.index_cast %37 : i32 to index
    %39 = memref.load %arg1[%38] : memref<16xi32, #tpu.memory_space<smem>>
    %40 = arith.index_cast %39 : i32 to index
    %c0_12 = arith.constant 0 : index
    %41 = vector.load %arg2[%40, %c0_12] : memref<1000x128xf32, #tpu.memory_space<vmem>>, vector<1x128xf32>
    %c6 = arith.constant 6 : index
    %c0_13 = arith.constant 0 : index
    %42 = vector.load %arg3[%c6, %c0_13] : memref<16x128xf32, #tpu.memory_space<vmem>>, vector<1x128xf32>
    tpu.vector_store %arg3[%c6, %c0_13], %41 {strides = array<i32>} : memref<16x128xf32, #tpu.memory_space<vmem>>, vector<1x128xf32>,
    %c7_i32 = arith.constant 7 : i32
    %43 = arith.addi %0, %c7_i32 : i32
    %44 = arith.index_cast %43 : i32 to index
    %45 = memref.load %arg1[%44] : memref<16xi32, #tpu.memory_space<smem>>
    %46 = arith.index_cast %45 : i32 to index
    %c0_14 = arith.constant 0 : index
    %47 = vector.load %arg2[%46, %c0_14] : memref<1000x128xf32, #tpu.memory_space<vmem>>, vector<1x128xf32>
    %c7 = arith.constant 7 : index
    %c0_15 = arith.constant 0 : index
    %48 = vector.load %arg3[%c7, %c0_15] : memref<16x128xf32, #tpu.memory_space<vmem>>, vector<1x128xf32>
    tpu.vector_store %arg3[%c7, %c0_15], %47 {strides = array<i32>} : memref<16x128xf32, #tpu.memory_space<vmem>>, vector<1x128xf32>,
    %c8_i32 = arith.constant 8 : i32
    %49 = arith.addi %0, %c8_i32 : i32
    %50 = arith.index_cast %49 : i32 to index
    %51 = memref.load %arg1[%50] : memref<16xi32, #tpu.memory_space<smem>>
    %52 = arith.index_cast %51 : i32 to index
    %c0_16 = arith.constant 0 : index
    %53 = vector.load %arg2[%52, %c0_16] : memref<1000x128xf32, #tpu.memory_space<vmem>>, vector<1x128xf32>
    %c8 = arith.constant 8 : index
    %c0_17 = arith.constant 0 : index
    %54 = vector.load %arg3[%c8, %c0_17] : memref<16x128xf32, #tpu.memory_space<vmem>>, vector<1x128xf32>
    tpu.vector_store %arg3[%c8, %c0_17], %53 {strides = array<i32>} : memref<16x128xf32, #tpu.memory_space<vmem>>, vector<1x128xf32>,
    %c9_i32 = arith.constant 9 : i32
    %55 = arith.addi %0, %c9_i32 : i32
    %56 = arith.index_cast %55 : i32 to index
    %57 = memref.load %arg1[%56] : memref<16xi32, #tpu.memory_space<smem>>
    %58 = arith.index_cast %57 : i32 to index
    %c0_18 = arith.constant 0 : index
    %59 = vector.load %arg2[%58, %c0_18] : memref<1000x128xf32, #tpu.memory_space<vmem>>, vector<1x128xf32>
    %c9 = arith.constant 9 : index
    %c0_19 = arith.constant 0 : index
    %60 = vector.load %arg3[%c9, %c0_19] : memref<16x128xf32, #tpu.memory_space<vmem>>, vector<1x128xf32>
    tpu.vector_store %arg3[%c9, %c0_19], %59 {strides = array<i32>} : memref<16x128xf32, #tpu.memory_space<vmem>>, vector<1x128xf32>,
    %c10_i32 = arith.constant 10 : i32
    %61 = arith.addi %0, %c10_i32 : i32
    %62 = arith.index_cast %61 : i32 to index
    %63 = memref.load %arg1[%62] : memref<16xi32, #tpu.memory_space<smem>>
    %64 = arith.index_cast %63 : i32 to index
    %c0_20 = arith.constant 0 : index
    %65 = vector.load %arg2[%64, %c0_20] : memref<1000x128xf32, #tpu.memory_space<vmem>>, vector<1x128xf32>
    %c10 = arith.constant 10 : index
    %c0_21 = arith.constant 0 : index
    %66 = vector.load %arg3[%c10, %c0_21] : memref<16x128xf32, #tpu.memory_space<vmem>>, vector<1x128xf32>
    tpu.vector_store %arg3[%c10, %c0_21], %65 {strides = array<i32>} : memref<16x128xf32, #tpu.memory_space<vmem>>, vector<1x128xf32>,
    %c11_i32 = arith.constant 11 : i32
    %67 = arith.addi %0, %c11_i32 : i32
    %68 = arith.index_cast %67 : i32 to index
    %69 = memref.load %arg1[%68] : memref<16xi32, #tpu.memory_space<smem>>
    %70 = arith.index_cast %69 : i32 to index
    %c0_22 = arith.constant 0 : index
    %71 = vector.load %arg2[%70, %c0_22] : memref<1000x128xf32, #tpu.memory_space<vmem>>, vector<1x128xf32>
    %c11 = arith.constant 11 : index
    %c0_23 = arith.constant 0 : index
    %72 = vector.load %arg3[%c11, %c0_23] : memref<16x128xf32, #tpu.memory_space<vmem>>, vector<1x128xf32>
    tpu.vector_store %arg3[%c11, %c0_23], %71 {strides = array<i32>} : memref<16x128xf32, #tpu.memory_space<vmem>>, vector<1x128xf32>,
    %c12_i32 = arith.constant 12 : i32
    %73 = arith.addi %0, %c12_i32 : i32
    %74 = arith.index_cast %73 : i32 to index
    %75 = memref.load %arg1[%74] : memref<16xi32, #tpu.memory_space<smem>>
    %76 = arith.index_cast %75 : i32 to index
    %c0_24 = arith.constant 0 : index
    %77 = vector.load %arg2[%76, %c0_24] : memref<1000x128xf32, #tpu.memory_space<vmem>>, vector<1x128xf32>
    %c12 = arith.constant 12 : index
    %c0_25 = arith.constant 0 : index
    %78 = vector.load %arg3[%c12, %c0_25] : memref<16x128xf32, #tpu.memory_space<vmem>>, vector<1x128xf32>
    tpu.vector_store %arg3[%c12, %c0_25], %77 {strides = array<i32>} : memref<16x128xf32, #tpu.memory_space<vmem>>, vector<1x128xf32>,
    %c13_i32 = arith.constant 13 : i32
    %79 = arith.addi %0, %c13_i32 : i32
    %80 = arith.index_cast %79 : i32 to index
    %81 = memref.load %arg1[%80] : memref<16xi32, #tpu.memory_space<smem>>
    %82 = arith.index_cast %81 : i32 to index
    %c0_26 = arith.constant 0 : index
    %83 = vector.load %arg2[%82, %c0_26] : memref<1000x128xf32, #tpu.memory_space<vmem>>, vector<1x128xf32>
    %c13 = arith.constant 13 : index
    %c0_27 = arith.constant 0 : index
    %84 = vector.load %arg3[%c13, %c0_27] : memref<16x128xf32, #tpu.memory_space<vmem>>, vector<1x128xf32>
    tpu.vector_store %arg3[%c13, %c0_27], %83 {strides = array<i32>} : memref<16x128xf32, #tpu.memory_space<vmem>>, vector<1x128xf32>,
    %c14_i32 = arith.constant 14 : i32
    %85 = arith.addi %0, %c14_i32 : i32
    %86 = arith.index_cast %85 : i32 to index
    %87 = memref.load %arg1[%86] : memref<16xi32, #tpu.memory_space<smem>>
    %88 = arith.index_cast %87 : i32 to index
    %c0_28 = arith.constant 0 : index
    %89 = vector.load %arg2[%88, %c0_28] : memref<1000x128xf32, #tpu.memory_space<vmem>>, vector<1x128xf32>
    %c14 = arith.constant 14 : index
    %c0_29 = arith.constant 0 : index
    %90 = vector.load %arg3[%c14, %c0_29] : memref<16x128xf32, #tpu.memory_space<vmem>>, vector<1x128xf32>
    tpu.vector_store %arg3[%c14, %c0_29], %89 {strides = array<i32>} : memref<16x128xf32, #tpu.memory_space<vmem>>, vector<1x128xf32>,
    %c15_i32 = arith.constant 15 : i32
    %91 = arith.addi %0, %c15_i32 : i32
    %92 = arith.index_cast %91 : i32 to index
    %93 = memref.load %arg1[%92] : memref<16xi32, #tpu.memory_space<smem>>
    %94 = arith.index_cast %93 : i32 to index
    %c0_30 = arith.constant 0 : index
    %95 = vector.load %arg2[%94, %c0_30] : memref<1000x128xf32, #tpu.memory_space<vmem>>, vector<1x128xf32>
    %c15 = arith.constant 15 : index
    %c0_31 = arith.constant 0 : index
    %96 = vector.load %arg3[%c15, %c0_31] : memref<16x128xf32, #tpu.memory_space<vmem>>, vector<1x128xf32>
    tpu.vector_store %arg3[%c15, %c0_31], %95 {strides = array<i32>} : memref<16x128xf32, #tpu.memory_space<vmem>>, vector<1x128xf32>,
    return
  }
  func.func @transform_0(%arg0: i32, %arg1: memref<16xi32, #tpu.memory_space<smem>>) -> (i32, i32) {
    %c0_i32 = arith.constant 0 : i32
    %c0_i32_0 = arith.constant 0 : i32
    %c0_i32_1 = arith.constant 0 : i32
    return %c0_i32, %c0_i32_0 : i32, i32
  }
  func.func @transform_1(%arg0: i32, %arg1: memref<16xi32, #tpu.memory_space<smem>>) -> (i32, i32) {
    %c0_i32 = arith.constant 0 : i32
    %c0_i32_0 = arith.constant 0 : i32
    return %arg0, %c0_i32 : i32, i32
  }
}

</mosaic_0001>

<bundles_post_ra>
// kernel: tpu_custom_call.1
= control target key start
LH: loop header
LB: loop body
LE: loop exit
PB: predicated region body
PF: predicated region fallthrough
CT: control target
= control target key end

     0   :  { %s235_s12 = smov [#allocation3]   ;;  %s270_s0 = inlined_call_operand.hbm [shape: s32[16], index: 0, kind: input, shape index: {}]   ;;  %s271_s1 = inlined_call_operand.hbm [shape: f32[1000,128], index: 1, kind: input, shape index: {}]   ;;  %s272_s2 = inlined_call_operand.hbm [shape: f32[16,128], index: 2, kind: output, shape index: {}]  }
   0x1   :  { %s8_s11 = sshll.u32 %s270_s0, 4  ;;  %s9_s11 = int_to_ptr.hbm [resolvable:$true] %s8_s11 }
   0x2   :  { %11 = dma.hbm_to_smem %s9_s11, 16, %s235_s12, [#allocation2] }
   0x3   :  { %229 = dma.done.wait [#allocation2], 16 }
   0x4   :  { %230 = vsyncadd [#allocation2], 4294967280 }
   0x5   :  { %14 = sfence }
   0x6   :  { %15 = vsyncpa [#allocation5], 0 }
   0x7   :  { %16 = vsyncpa [#allocation6], 0  ;;  %s21_s15 = sshll.u32 %s271_s1, 4  ;;  %s236_s16 = smov [#allocation4]   ;;  %s22_s15 = int_to_ptr.hbm [resolvable:$true] %s21_s15 }
   0x8   :  { %s23_s17 = sshll.u32 %s236_s16, 4  ;;  %s237_s18 = smov 128   ;;  %s24_s17 = int_to_ptr.vmem [resolvable:$true] %s23_s17 }
   0x9   :  { %s238_s19 = smov 8  }
   0xa   :  { %29 = dma.hbm_to_vmem [thread:$0]  %s22_s15, 16000, %s24_s17, [#allocation5], %s237_s18, %s237_s18, %s238_s19  }
   0xb   :  { %231 = dma.done.wait [#allocation5], 16000  }
   0xc   :  { %232 = vsyncadd [#allocation5], 4294951296  ;;  %s35_s0 = sld [smem:[#allocation3]]  ;;  %s239_s17 = smov [#allocation7]  }
   0xd   :  { %s149_s20 = sld [smem:[#allocation3 + $0x1]] }
   0xe   :  { %s150_s21 = sld [smem:[#allocation3 + $0x2]] }
   0xf   :  { %s151_s22 = sld [smem:[#allocation3 + $0x3]] }
  0x10   :  { %s152_s23 = sld [smem:[#allocation3 + $0x4]] }
  0x11   :  { %s153_s24 = sld [smem:[#allocation3 + $0x5]] }
  0x12   :  { %s154_s25 = sld [smem:[#allocation3 + $0x6]]  ;;  %s36_s1 = scalar_lea.vmem [#allocation4], %s35_s0 }
  0x13   :  { %v37_v0 = vld [vmem:[%s36_s1] sm:$0x1]  ;;  %s155_s26 = sld [smem:[#allocation3 + $0x7]]  ;;  %s41_s27 = scalar_lea.vmem [#allocation4], %s149_s20 }
  0x14   :  { %38 = vst [vmem:[#allocation7] sm:$0x1] %v37_v0  ;;  %v42_v1 = vld [vmem:[%s41_s27] sm:$0x1]  ;;  %s46_s28 = scalar_lea.vmem [#allocation4], %s150_s21  ;;  %s156_s6 = sld [smem:[#allocation3 + $0x8]] }
  0x15   :  { %43 = vst [vmem:[#allocation7 + $0x1] sm:$0x1] %v42_v1  ;;  %v47_v2 = vld [vmem:[%s46_s28] sm:$0x1]  ;;  %s51_s29 = scalar_lea.vmem [#allocation4], %s151_s22  ;;  %s157_s7 = sld [smem:[#allocation3 + $0x9]] }
  0x16   :  { %48 = vst [vmem:[#allocation7 + $0x2] sm:$0x1] %v47_v2  ;;  %v52_v3 = vld [vmem:[%s51_s29] sm:$0x1]  ;;  %s56_s30 = scalar_lea.vmem [#allocation4], %s152_s23  ;;  %s158_s8 = sld [smem:[#allocation3 + $0xa]] }
  0x17   :  { %53 = vst [vmem:[#allocation7 + $0x3] sm:$0x1] %v52_v3  ;;  %v57_v4 = vld [vmem:[%s56_s30] sm:$0x1]  ;;  %s61_s3 = scalar_lea.vmem [#allocation4], %s153_s24  ;;  %s159_s9 = sld [smem:[#allocation3 + $0xb]] }
  0x18   :  { %58 = vst [vmem:[#allocation7 + $0x4] sm:$0x1] %v57_v4  ;;  %v62_v5 = vld [vmem:[%s61_s3] sm:$0x1]  ;;  %s66_s4 = scalar_lea.vmem [#allocation4], %s154_s25  ;;  %s160_s10 = sld [smem:[#allocation3 + $0xc]] }
  0x19   :  { %63 = vst [vmem:[#allocation7 + $0x5] sm:$0x1] %v62_v5  ;;  %v67_v6 = vld [vmem:[%s66_s4] sm:$0x1]  ;;  %s71_s5 = scalar_lea.vmem [#allocation4], %s155_s26  ;;  %s161_s11 = sld [smem:[#allocation3 + $0xd]] }
  0x1a   :  { %68 = vst [vmem:[#allocation7 + $0x6] sm:$0x1] %v67_v6  ;;  %v72_v7 = vld [vmem:[%s71_s5] sm:$0x1]  ;;  %s162_s12 = sld [smem:[#allocation3 + $0xe]]  ;;  %s76_s13 = scalar_lea.vmem [#allocation4], %s156_s6 }
  0x1b   :  { %73 = vst [vmem:[#allocation7 + $0x7] sm:$0x1] %v72_v7  ;;  %v77_v8 = vld [vmem:[%s76_s13] sm:$0x1]  ;;  %s163_s14 = sld [smem:[#allocation3 + $0xf]]  ;;  %s81_s15 = scalar_lea.vmem [#allocation4], %s157_s7 }
  0x1c   :  { %78 = vst [vmem:[#allocation7 + $0x8] sm:$0x1] %v77_v8  ;;  %v82_v9 = vld [vmem:[%s81_s15] sm:$0x1]  ;;  %s86_s16 = scalar_lea.vmem [#allocation4], %s158_s8  ;;  %s118_s0 = sshll.u32 %s239_s17, 4  ;;  %s119_s0 = int_to_ptr.vmem [resolvable:$true] %s118_s0 }
  0x1d   :  { %83 = vst [vmem:[#allocation7 + $0x9] sm:$0x1] %v82_v9  ;;  %v87_v10 = vld [vmem:[%s86_s16] sm:$0x1]  ;;  %s91_s20 = scalar_lea.vmem [#allocation4], %s159_s9  ;;  %s120_s23 = sshll.u32 %s272_s2, 4  ;;  %s121_s23 = int_to_ptr.hbm [resolvable:$true] %s120_s23 }
  0x1e   :  { %88 = vst [vmem:[#allocation7 + $0xa] sm:$0x1] %v87_v10  ;;  %v92_v11 = vld [vmem:[%s91_s20] sm:$0x1]  ;;  %s96_s24 = scalar_lea.vmem [#allocation4], %s160_s10 }
  0x1f   :  { %93 = vst [vmem:[#allocation7 + $0xb] sm:$0x1] %v92_v11  ;;  %v97_v12 = vld [vmem:[%s96_s24] sm:$0x1]  ;;  %s101_s25 = scalar_lea.vmem [#allocation4], %s161_s11 }
  0x20   :  { %98 = vst [vmem:[#allocation7 + $0xc] sm:$0x1] %v97_v12  ;;  %v102_v13 = vld [vmem:[%s101_s25] sm:$0x1]  ;;  %s106_s1 = scalar_lea.vmem [#allocation4], %s162_s12 }
  0x21   :  { %103 = vst [vmem:[#allocation7 + $0xd] sm:$0x1] %v102_v13  ;;  %v107_v14 = vld [vmem:[%s106_s1] sm:$0x1]  ;;  %s111_s26 = scalar_lea.vmem [#allocation4], %s163_s14 }
  0x22   :  { %108 = vst [vmem:[#allocation7 + $0xe] sm:$0x1] %v107_v14  ;;  %v112_v15 = vld [vmem:[%s111_s26] sm:$0x1] }
  0x23   :  { %113 = vst [vmem:[#allocation7 + $0xf] sm:$0x1] %v112_v15 }
  0x24   :  { %126 = dma.vmem_to_hbm [thread:$0]  %s119_s0, 256, %s121_s23, [#allocation6], %s237_s18, %s237_s18, %s238_s19  }
  0x25   :  { %233 = dma.done.wait [#allocation6], 256  }
  0x26   :  { %234 = vsyncadd [#allocation6], 4294967040 }
  0x27   :  { %131 = vsyncpa [#allocation5], 1 }
  0x28   :  { %132 = vsyncpa [#allocation6], 1 }

</bundles_post_ra>
